<compile_context>
chip_gen: v7x
topology: tpu7x:2x2x1
jax: 0.10.0
libtpu: 0.0.40
codegen_flags: <defaults>
</compile_context>

<pallas_src>
import functools

import jax
import jax.numpy as jnp
from jax import lax
from jax.experimental import pallas as pl
from jax.experimental.pallas import tpu as pltpu


def _cag_kernel(x_ref, w1t_ref, b1_ref, w2t_ref, b2_ref, o_ref,
                sum_acc, max_acc, *, inv_hw, mask_tail, tail_len):
    """Grid = (batch blocks, HW chunks).
    x block: (TN, C, hw_tile), input dtype.  w*t: (C_in, C_out) f32,
    b*: (1, C) f32.  Output block: (TN, 1, C).  Scratch: (TN, C) f32 x2."""
    k = pl.program_id(1)
    nk = pl.num_programs(1)

    @pl.when(k == 0)
    def _init():
        sum_acc[...] = jnp.zeros_like(sum_acc)
        max_acc[...] = jnp.full_like(max_acc, -jnp.inf)

    def _accumulate(masked):
        x = x_ref[...].astype(jnp.float32)              # (TN, C, hw_tile)
        if masked:
            # Only the final ragged HW chunk pays for the mask.
            lane = lax.broadcasted_iota(jnp.int32, (1, 1, x.shape[2]), 2)
            valid = lane < tail_len
            x_sum = jnp.where(valid, x, 0.0)
            x_max = jnp.where(valid, x, -jnp.inf)
        else:
            x_sum, x_max = x, x
        sum_acc[...] += jnp.sum(x_sum, axis=2)          # running global sum
        max_acc[...] = jnp.maximum(max_acc[...], jnp.max(x_max, axis=2))

    if mask_tail:
        @pl.when(k < nk - 1)
        def _full_chunks():
            _accumulate(False)

        @pl.when(k == nk - 1)
        def _tail_chunk():
            _accumulate(True)
    else:
        _accumulate(False)

    @pl.when(k == nk - 1)
    def _finalize():
        avg = sum_acc[...] * inv_hw                     # global average pool
        mx = max_acc[...]                               # global max pool
        y1 = jnp.dot(avg, w1t_ref[...],
                     preferred_element_type=jnp.float32) + b1_ref[...]
        y2 = jnp.dot(mx, w2t_ref[...],
                     preferred_element_type=jnp.float32) + b2_ref[...]
        y = jnp.maximum(y1, 0.0) + jnp.maximum(y2, 0.0)  # relu(fc1)+relu(fc2)
        o_ref[:, 0, :] = jax.nn.sigmoid(y).astype(o_ref.dtype)


def cag_forward(x_nchw, w1, b1, w2, b2, *, hw_tile=None,
                max_block_bytes=8 * 1024 * 1024,
                vmem_limit_bytes=48 * 1024 * 1024):
    """x_nchw: (N, C, H, W) float.  w*: (C, C) [Conv2d 1x1 weight squeezed],
    b*: (C,).  Returns (N, C, 1, 1) in x's float dtype."""
    N, C, H, W = x_nchw.shape
    HW = H * W

    x = jnp.asarray(x_nchw)
    if not jnp.issubdtype(x.dtype, jnp.floating):
        x = x.astype(jnp.float32)
    x_flat = x.reshape(N, C, HW)            # free view of contiguous NCHW
    itemsize = jnp.dtype(x_flat.dtype).itemsize

    # Conv1x1: out[co] = sum_ci W[co,ci]*in[ci] + b[co]  ==>  pooled @ W.T + b
    w1t = jnp.asarray(w1, jnp.float32).T
    w2t = jnp.asarray(w2, jnp.float32).T
    b1r = jnp.asarray(b1, jnp.float32).reshape(1, C)
    b2r = jnp.asarray(b2, jnp.float32).reshape(1, C)

    # VMEM footprint per (n, c) slab: C pads to the sublane tile.
    c_sub = 8 * max(1, 4 // itemsize)       # 8 sublanes for f32, 16 for bf16
    c_pad = -(-C // c_sub) * c_sub
    sample_bytes = c_pad * HW * itemsize

    # Batch tile: as many samples as fill the per-block budget (no TN=8 cap).
    TN = int(min(N, max(1, max_block_bytes // sample_bytes)))
    # Megacore (v7x): keep >= 2 blocks on the "parallel" batch axis.
    if N >= 2 and -(-N // TN) == 1:
        TN = -(-N // 2)
    # TODO(synk): for N == 1 a per-core HW split (partial accumulators + tiny
    # combine pass) would use both v7x TensorCores; single-core path today.

    # HW tile: multiple of 128 lanes, sized so the x block fits the budget.
    if hw_tile is None:
        row_bytes = TN * c_pad * itemsize
        if row_bytes * HW <= max_block_bytes:
            hw_tile = HW
        else:
            hw_tile = max(128, (max_block_bytes // row_bytes) // 128 * 128)
    hw_tile = int(min(hw_tile, HW))
    num_hw = -(-HW // hw_tile)
    mask_tail = (HW % hw_tile) != 0
    tail_len = HW - (num_hw - 1) * hw_tile

    grid = (-(-N // TN), num_hw)

    kernel = functools.partial(_cag_kernel, inv_hw=1.0 / HW,
                               mask_tail=mask_tail, tail_len=tail_len)

    cost = pl.CostEstimate(
        flops=2 * N * C * HW + 4 * N * C * C,
        transcendentals=N * C,
        bytes_accessed=N * C * HW * itemsize + (2 * C * C + 2 * C) * 4
        + N * C * itemsize,
    )

    out = pl.pallas_call(
        kernel,
        out_shape=jax.ShapeDtypeStruct((N, 1, C), x_flat.dtype),
        grid_spec=pltpu.PrefetchScalarGridSpec(
            num_scalar_prefetch=0,
            grid=grid,
            in_specs=[
                pl.BlockSpec((TN, C, hw_tile), lambda i, k: (i, 0, k)),
                # Grid-invariant operands: constant index_map => no re-DMA.
                pl.BlockSpec((C, C), lambda i, k: (0, 0)),
                pl.BlockSpec((1, C), lambda i, k: (0, 0)),
                pl.BlockSpec((C, C), lambda i, k: (0, 0)),
                pl.BlockSpec((1, C), lambda i, k: (0, 0)),
            ],
            out_specs=pl.BlockSpec((TN, 1, C), lambda i, k: (i, 0, 0)),
            scratch_shapes=[
                pltpu.VMEM((TN, C), jnp.float32),       # running global sum
                pltpu.VMEM((TN, C), jnp.float32),       # running global max
            ],
        ),
        compiler_params=pltpu.CompilerParams(
            dimension_semantics=("parallel", "arbitrary"),
            vmem_limit_bytes=vmem_limit_bytes,
        ),
        cost_estimate=cost,
    )(x_flat, w1t, b1r, w2t, b2r)

    return out.reshape(N, C, 1, 1)


def cag_reference(x_nchw, w1, b1, w2, b2):
    """Pure-JAX reference mirroring the PyTorch module (NCHW), f32 math."""
    xf = x_nchw.astype(jnp.float32)
    avg = jnp.mean(xf, axis=(2, 3))                     # (N, C)
    mx = jnp.max(xf, axis=(2, 3))                       # (N, C)
    y1 = jnp.maximum(avg @ w1.T + b1, 0.0)
    y2 = jnp.maximum(mx @ w2.T + b2, 0.0)
    return jax.nn.sigmoid(y1 + y2)[:, :, None, None]


if __name__ == "__main__":
    # Primary small test (module-consistent shapes).
    N, C, H, W = 2, 4, 16, 16
    key = jax.random.PRNGKey(0)
    kx, kw1, kb1, kw2, kb2 = jax.random.split(key, 5)

    x = jax.random.normal(kx, (N, C, H, W), dtype=jnp.float32)
    # Conv2d(C, C, 1) -> weight (C, C, 1, 1) squeezed to (C, C), bias (C,).
    w1 = jax.random.normal(kw1, (C, C), dtype=jnp.float32) * 0.5
    b1 = jax.random.normal(kb1, (C,), dtype=jnp.float32) * 0.1
    w2 = jax.random.normal(kw2, (C, C), dtype=jnp.float32) * 0.5
    b2 = jax.random.normal(kb2, (C,), dtype=jnp.float32) * 0.1

    out = jax.block_until_ready(cag_forward(x, w1, b1, w2, b2))
    ref = cag_reference(x, w1, b1, w2, b2)
    assert out.shape == (N, C, 1, 1)
    assert jnp.allclose(out, ref, atol=1e-5, rtol=1e-5), "mismatch (basic)"

    # Chunked HW with ragged tail (130 = 128 + 2) and ragged batch (N % TN != 0)
    # to exercise the gated tail mask and the accumulator path.
    N2, C2, H2, W2 = 3, 8, 10, 13
    k2 = jax.random.split(jax.random.PRNGKey(1), 5)
    x2 = jax.random.normal(k2[0], (N2, C2, H2, W2), dtype=jnp.float32)
    w1b = jax.random.normal(k2[1], (C2, C2), dtype=jnp.float32) * 0.5
    b1b = jax.random.normal(k2[2], (C2,), dtype=jnp.float32) * 0.1
    w2b = jax.random.normal(k2[3], (C2, C2), dtype=jnp.float32) * 0.5
    b2b = jax.random.normal(k2[4], (C2,), dtype=jnp.float32) * 0.1

    out2 = jax.block_until_ready(
        cag_forward(x2, w1b, b1b, w2b, b2b, hw_tile=128))
    ref2 = cag_reference(x2, w1b, b1b, w2b, b2b)
    assert out2.shape == (N2, C2, 1, 1)
    assert jnp.allclose(out2, ref2, atol=1e-5, rtol=1e-5), "mismatch (chunked)"

    # Native bf16 streaming path (half HBM bytes; f32 accumulation in-kernel).
    N3, C3, H3, W3 = 4, 8, 9, 15
    k3 = jax.random.split(jax.random.PRNGKey(2), 5)
    x3 = jax.random.normal(k3[0], (N3, C3, H3, W3), dtype=jnp.bfloat16)
    w1c = jax.random.normal(k3[1], (C3, C3), dtype=jnp.float32) * 0.5
    b1c = jax.random.normal(k3[2], (C3,), dtype=jnp.float32) * 0.1
    w2c = jax.random.normal(k3[3], (C3, C3), dtype=jnp.float32) * 0.5
    b2c = jax.random.normal(k3[4], (C3,), dtype=jnp.float32) * 0.1

    out3 = jax.block_until_ready(
        cag_forward(x3, w1c, b1c, w2c, b2c, hw_tile=128))
    ref3 = cag_reference(x3, w1c, b1c, w2c, b2c)
    assert out3.shape == (N3, C3, 1, 1)
    assert jnp.allclose(out3.astype(jnp.float32), ref3,
                        atol=1e-2, rtol=1e-2), "mismatch (bf16)"

    print("KERNEL_OK")
</pallas_src>

<mosaic_0001>
module attributes {stable_mosaic.version = 11 : i64} {
  func.func @_cag_kernel(%arg0: i32, %arg1: i32, %arg2: memref<1x4x256xf32, #tpu.memory_space<vmem>>, %arg3: memref<4x4xf32, #tpu.memory_space<vmem>>, %arg4: memref<1x4xf32, #tpu.memory_space<vmem>>, %arg5: memref<4x4xf32, #tpu.memory_space<vmem>>, %arg6: memref<1x4xf32, #tpu.memory_space<vmem>>, %arg7: memref<1x1x4xf32, #tpu.memory_space<vmem>>, %arg8: memref<1x4xf32, #tpu.memory_space<vmem>>, %arg9: memref<1x4xf32, #tpu.memory_space<vmem>>) attributes {dimension_semantics = [#tpu.dimension_semantics<parallel>, #tpu.dimension_semantics<arbitrary>], iteration_bounds = array<i64: 2, 1>, scalar_prefetch = 0 : i64, scratch_operands = 2 : i64, tpu.core_type = #tpu.core_type<tc>, window_params = [{transform_indices = @transform_0, window_bounds = array<i64: 1, 4, 256>}, {pipeline_mode = #tpu.pipeline_mode<synchronous>, transform_indices = @transform_1, window_bounds = array<i64: 4, 4>}, {pipeline_mode = #tpu.pipeline_mode<synchronous>, transform_indices = @transform_2, window_bounds = array<i64: 1, 4>}, {pipeline_mode = #tpu.pipeline_mode<synchronous>, transform_indices = @transform_3, window_bounds = array<i64: 4, 4>}, {pipeline_mode = #tpu.pipeline_mode<synchronous>, transform_indices = @transform_4, window_bounds = array<i64: 1, 4>}, {transform_indices = @transform_5, window_bounds = array<i64: 1, 1, 4>}]} {
    %c0_i32 = arith.constant 0 : i32
    %0 = arith.cmpi eq, %arg1, %c0_i32 : i32
    %1 = arith.extui %0 : i1 to i32
    %c0_i32_0 = arith.constant 0 : i32
    %2 = arith.cmpi ne, %1, %c0_i32_0 : i32
    scf.if %2 {
      %cst_14 = arith.constant 0.000000e+00 : f32
      %15 = vector.broadcast %cst_14 : f32 to vector<1x4xf32>
      %c0_15 = arith.constant 0 : index
      %c0_16 = arith.constant 0 : index
      %16 = vector.load %arg8[%c0_15, %c0_16] : memref<1x4xf32, #tpu.memory_space<vmem>>, vector<1x4xf32>
      tpu.vector_store %arg8[%c0_15, %c0_16], %15 {strides = array<i32>} : memref<1x4xf32, #tpu.memory_space<vmem>>, vector<1x4xf32>,
      %cst_17 = arith.constant 0xFF800000 : f32
      %17 = vector.broadcast %cst_17 : f32 to vector<1x4xf32>
      %c0_18 = arith.constant 0 : index
      %c0_19 = arith.constant 0 : index
      %18 = vector.load %arg9[%c0_18, %c0_19] : memref<1x4xf32, #tpu.memory_space<vmem>>, vector<1x4xf32>
      tpu.vector_store %arg9[%c0_18, %c0_19], %17 {strides = array<i32>} : memref<1x4xf32, #tpu.memory_space<vmem>>, vector<1x4xf32>,
    } else {
    }
    %c0 = arith.constant 0 : index
    %c0_1 = arith.constant 0 : index
    %c0_2 = arith.constant 0 : index
    %3 = vector.load %arg2[%c0, %c0_1, %c0_2] : memref<1x4x256xf32, #tpu.memory_space<vmem>>, vector<1x4x256xf32>
    %c0_3 = arith.constant 0 : index
    %c0_4 = arith.constant 0 : index
    %4 = vector.load %arg8[%c0_3, %c0_4] : memref<1x4xf32, #tpu.memory_space<vmem>>, vector<1x4xf32>
    %cst = arith.constant dense<0.000000e+00> : vector<1x4xf32>
    %5 = vector.multi_reduction <add>, %3, %cst [2] : vector<1x4x256xf32> to vector<1x4xf32>
    %6 = arith.addf %4, %5 : vector<1x4xf32>
    %c0_5 = arith.constant 0 : index
    %c0_6 = arith.constant 0 : index
    %7 = vector.load %arg8[%c0_5, %c0_6] : memref<1x4xf32, #tpu.memory_space<vmem>>, vector<1x4xf32>
    tpu.vector_store %arg8[%c0_5, %c0_6], %6 {strides = array<i32>} : memref<1x4xf32, #tpu.memory_space<vmem>>, vector<1x4xf32>,
    %c0_7 = arith.constant 0 : index
    %c0_8 = arith.constant 0 : index
    %8 = vector.load %arg9[%c0_7, %c0_8] : memref<1x4xf32, #tpu.memory_space<vmem>>, vector<1x4xf32>
    %cst_9 = arith.constant dense<0xFF800000> : vector<1x4xf32>
    %9 = vector.multi_reduction <maximumf>, %3, %cst_9 [2] : vector<1x4x256xf32> to vector<1x4xf32>
    %10 = arith.maximumf %8, %9 : vector<1x4xf32>
    %c0_10 = arith.constant 0 : index
    %c0_11 = arith.constant 0 : index
    %11 = vector.load %arg9[%c0_10, %c0_11] : memref<1x4xf32, #tpu.memory_space<vmem>>, vector<1x4xf32>
    tpu.vector_store %arg9[%c0_10, %c0_11], %10 {strides = array<i32>} : memref<1x4xf32, #tpu.memory_space<vmem>>, vector<1x4xf32>,
    %c0_i32_12 = arith.constant 0 : i32
    %12 = arith.cmpi eq, %arg1, %c0_i32_12 : i32
    %13 = arith.extui %12 : i1 to i32
    %c0_i32_13 = arith.constant 0 : i32
    %14 = arith.cmpi ne, %13, %c0_i32_13 : i32
    scf.if %14 {
      %c0_14 = arith.constant 0 : index
      %c0_15 = arith.constant 0 : index
      %15 = vector.load %arg8[%c0_14, %c0_15] : memref<1x4xf32, #tpu.memory_space<vmem>>, vector<1x4xf32>
      %cst_16 = arith.constant 3.906250e-03 : f32
      %16 = vector.broadcast %cst_16 : f32 to vector<1x4xf32>
      %17 = arith.mulf %15, %16 : vector<1x4xf32>
      %c0_17 = arith.constant 0 : index
      %c0_18 = arith.constant 0 : index
      %18 = vector.load %arg9[%c0_17, %c0_18] : memref<1x4xf32, #tpu.memory_space<vmem>>, vector<1x4xf32>
      %c0_19 = arith.constant 0 : index
      %c0_20 = arith.constant 0 : index
      %19 = vector.load %arg3[%c0_19, %c0_20] : memref<4x4xf32, #tpu.memory_space<vmem>>, vector<4x4xf32>
      %cst_21 = arith.constant dense<0.000000e+00> : vector<1x4xf32>
      %20 = tpu.matmul %17, %19, %cst_21 {dimension_numbers = #tpu.dot_dimension_numbers<[1], [0], [0], [1], [0, 0, 1, 1], [], []>} : vector<1x4xf32>, vector<4x4xf32>, vector<1x4xf32> -> vector<1x4xf32>
      %c0_22 = arith.constant 0 : index
      %c0_23 = arith.constant 0 : index
      %21 = vector.load %arg4[%c0_22, %c0_23] : memref<1x4xf32, #tpu.memory_space<vmem>>, vector<1x4xf32>
      %22 = arith.addf %20, %21 : vector<1x4xf32>
      %c0_24 = arith.constant 0 : index
      %c0_25 = arith.constant 0 : index
      %23 = vector.load %arg5[%c0_24, %c0_25] : memref<4x4xf32, #tpu.memory_space<vmem>>, vector<4x4xf32>
      %cst_26 = arith.constant dense<0.000000e+00> : vector<1x4xf32>
      %24 = tpu.matmul %18, %23, %cst_26 {dimension_numbers = #tpu.dot_dimension_numbers<[1], [0], [0], [1], [0, 0, 1, 1], [], []>} : vector<1x4xf32>, vector<4x4xf32>, vector<1x4xf32> -> vector<1x4xf32>
      %c0_27 = arith.constant 0 : index
      %c0_28 = arith.constant 0 : index
      %25 = vector.load %arg6[%c0_27, %c0_28] : memref<1x4xf32, #tpu.memory_space<vmem>>, vector<1x4xf32>
      %26 = arith.addf %24, %25 : vector<1x4xf32>
      %cst_29 = arith.constant 0.000000e+00 : f32
      %27 = vector.broadcast %cst_29 : f32 to vector<1x4xf32>
      %28 = arith.maximumf %22, %27 : vector<1x4xf32>
      %cst_30 = arith.constant 0.000000e+00 : f32
      %29 = vector.broadcast %cst_30 : f32 to vector<1x4xf32>
      %30 = arith.maximumf %26, %29 : vector<1x4xf32>
      %31 = arith.addf %28, %30 : vector<1x4xf32>
      %32 = arith.negf %31 : vector<1x4xf32>
      %33 = math.exp %32 : vector<1x4xf32>
      %cst_31 = arith.constant 1.000000e+00 : f32
      %34 = vector.broadcast %cst_31 : f32 to vector<1x4xf32>
      %35 = arith.addf %34, %33 : vector<1x4xf32>
      %36 = arith.divf %34, %35 : vector<1x4xf32>
      %c0_32 = arith.constant 0 : index
      %c0_33 = arith.constant 0 : index
      %c0_34 = arith.constant 0 : index
      %37 = vector.load %arg7[%c0_32, %c0_33, %c0_34] : memref<1x1x4xf32, #tpu.memory_space<vmem>>, vector<1x1x4xf32>
      %38 = vector.shape_cast %37 : vector<1x1x4xf32> to vector<1x4xf32>
      %39 = vector.shape_cast %36 : vector<1x4xf32> to vector<1x1x4xf32>
      tpu.vector_store %arg7[%c0_32, %c0_33, %c0_34], %39 {strides = array<i32>} : memref<1x1x4xf32, #tpu.memory_space<vmem>>, vector<1x1x4xf32>,
    } else {
    }
    return
  }
  func.func @transform_0(%arg0: i32, %arg1: i32) -> (i32, i32, i32) {
    %c0_i32 = arith.constant 0 : i32
    %c0_i32_0 = arith.constant 0 : i32
    return %arg0, %c0_i32, %arg1 : i32, i32, i32
  }
  func.func @transform_1(%arg0: i32, %arg1: i32) -> (i32, i32) {
    %c0_i32 = arith.constant 0 : i32
    %c0_i32_0 = arith.constant 0 : i32
    %c0_i32_1 = arith.constant 0 : i32
    return %c0_i32, %c0_i32_0 : i32, i32
  }
  func.func @transform_2(%arg0: i32, %arg1: i32) -> (i32, i32) {
    %c0_i32 = arith.constant 0 : i32
    %c0_i32_0 = arith.constant 0 : i32
    %c0_i32_1 = arith.constant 0 : i32
    return %c0_i32, %c0_i32_0 : i32, i32
  }
  func.func @transform_3(%arg0: i32, %arg1: i32) -> (i32, i32) {
    %c0_i32 = arith.constant 0 : i32
    %c0_i32_0 = arith.constant 0 : i32
    %c0_i32_1 = arith.constant 0 : i32
    return %c0_i32, %c0_i32_0 : i32, i32
  }
  func.func @transform_4(%arg0: i32, %arg1: i32) -> (i32, i32) {
    %c0_i32 = arith.constant 0 : i32
    %c0_i32_0 = arith.constant 0 : i32
    %c0_i32_1 = arith.constant 0 : i32
    return %c0_i32, %c0_i32_0 : i32, i32
  }
  func.func @transform_5(%arg0: i32, %arg1: i32) -> (i32, i32, i32) {
    %c0_i32 = arith.constant 0 : i32
    %c0_i32_0 = arith.constant 0 : i32
    %c0_i32_1 = arith.constant 0 : i32
    return %arg0, %c0_i32, %c0_i32_0 : i32, i32, i32
  }
}

</mosaic_0001>

<bundles_post_ra>
// kernel: tpu_custom_call.1
= control target key start
LH: loop header
LB: loop body
LE: loop exit
PB: predicated region body
PF: predicated region fallthrough
CT: control target
= control target key end

     0   :  { %10 = vsyncpa [#allocation5], 0  ;;  %s1240_s0 = inlined_call_operand.hbm [shape: f32[2,4,256], index: 0, kind: input, shape index: {}]   ;;  %s1241_s1 = inlined_call_operand.hbm [shape: f32[4,4], index: 1, kind: input, shape index: {}]   ;;  %s1242_s2 = inlined_call_operand.vmem [shape: f32[1,4], index: 2, kind: input, shape index: {}]   ;;  %s1243_s3 = inlined_call_operand.vmem [shape: f32[4,4], index: 3, kind: input, shape index: {}]   ;;  %s1244_s4 = inlined_call_operand.vmem [shape: f32[1,4], index: 4, kind: input, shape index: {}]   ;;  %s1245_s5 = inlined_call_operand.hbm [shape: f32[2,1,4], index: 5, kind: output, shape index: {}]  }
   0x1   :  { %12 = vsyncpa [#allocation5 + $0x1], 0 }
   0x2   :  { %13 = vsyncpa [#allocation8], 0 }
   0x3   :  { %14 = vsyncpa [#allocation6], 0 }
   0x4   :  { %16 = vsyncpa [#allocation6 + $0x1], 0  ;;  %s1003_s18 = smov 0   ;;  %s1005_s19 = smov 0  }
   0x5   :  { %s1007_s20 = smov 0   ;;  %s1009_s21 = smov 0  }
   0x6   :  { %s1011_s22 = smov 0   ;;  %s1013_s23 = smov 0  }
   0x7 LB: > { %s700_s24 = sadd.s32 4294967295, %s963_s23   ;;  %s701_s25 = sadd.s32 4294967294, %s963_s23   ;;  %s963_s23 = sphi %s1013_s23, %s22_s23   ;;  %s959_s22 = sphi %s1011_s22, %s1270_s22   ;;  %s955_s21 = sphi %s1009_s21, %s1269_s21   ;;  %s951_s20 = sphi %s1007_s20, %s1268_s20   ;;  %s947_s19 = sphi %s1005_s19, %s1267_s19   ;;  %s943_s18 = sphi %s1003_s18, %s1266_s18  }
   0x8   : > { %p56_p0 = scmp.ne.s32.totalorder %s947_s19, %s943_s18  ;;  %p1037_p1 = scmp.eq.s32.totalorder %s700_s24, 0 }
   0x9   : > { %p1041_p2 = scmp.eq.s32.totalorder %s700_s24, 1  ;;  %p170_p3 = scmp.eq.s32.totalorder %s701_s25, 1 }
   0xa   : > { %s1250_s26 = scalar_select %p1037_p1, 1, 0 }
   0xb   : > { %s1251_s27 = scalar_select %p1041_p2, 1, 0 }
   0xc   : > { %p1047_p4 = por %p1037_p1, %p56_p0  ;;  %p702_p5 = scmp.ge.s32.totalorder %s963_s23, 1 }
   0xd   : > { %p1052_p6 = por %p170_p3, %p56_p0  ;;  %p177_p7 = scmp.lt.s32.totalorder %s963_s23, 3 }
   0xe   : > { %s1252_s28 = scalar_select %p1047_p4, 1, 0 }
   0xf   : > { %s1253_s29 = scalar_select %p1052_p6, 1, 0 }
  0x10   : > { %p1057_p8 = pnand %p702_p5, %p177_p7  ;;  %s965_s6 = smov [#allocation7]  }
  0x11   : > { %s190_s7 = sshll.u32 %s965_s6, 4  ;;  %s34_s9 = sadd.s32 1, %s959_s22  ;;  %s191_s7 = int_to_ptr.vmem [resolvable:$true] %s190_s7 }
  0x12   : > { %s1254_s30 = scalar_select %p1057_p8, 1, 0 }
  0x13   : > { %p742_p10 = pneg %p1057_p8  ;;  %s43_s10 = sadd.s32 1, %s951_s20 }
  0x14   : > { %p1072_p12 = scmp.ge.s32.totalorder %s34_s9, 2  ;;  %s819_s14 = scalar_lea.hbm %s1241_s1, 64 }
  0x15   : > { %p1066_p11 = pnand %p742_p10, %p1037_p1  ;;  %p820_p13 = scmp.ne.s32.totalorder %s1241_s1, %s819_s14 }
  0x16   : > { %s1256_s11 = scalar_select %p1072_p12, 1, 0 }
  0x17   : > { %p821_p0 = pneg %p1066_p11  ;;  %p826_p7 = scmp.lt.u32.totalorder %s819_s14, %s1241_s1 }
  0x19   : > { %p822_p3 = pnand %p821_p0, %p820_p13 }
  0x1b   : > { %p823_p5 = pneg %p822_p3 }
  0x1d   : > { %p828_p10 = pnand %p826_p7, %p823_p5 }
  0x1f   : > { %831 = shalt.err (!%p828_p10)
}
  0x20   : > { %s832_s25 = scalar_lea.vmem %s191_s7, 64  ;;  %p840_p4 = scmp.lt.s32.totalorder %s191_s7, %s191_s7 }
  0x21   : > { %p833_p9 = scmp.ne.s32.totalorder %s191_s7, %s832_s25  ;;  %p841_p8 = scmp.lt.s32.totalorder %s832_s25, %s832_s25 }
  0x23   : > { %p835_p6 = pnand %p833_p9, %p821_p0  ;;  %p842_p2 = por %p841_p8, %p840_p4 }
  0x25   : > { %p836_p1 = pneg %p835_p6 }
  0x27   : > { %p843_p12 = pnand %p842_p2, %p836_p1 }
  0x29   : > { %846 = shalt.err (!%p843_p12)
}
  0x2a   : > { %745 = dma.hbm_to_vmem [thread:$0]  (!%p1066_p11), %s1241_s1, 64, %s191_s7, [#allocation8]  }
  0x2b   : > { %p1257_p4 = scmp.ne.s32.totalorder %s1256_s11, 0  ;;  %p50_p1 = scmp.ne.s32.totalorder %s951_s20, %s947_s19 }
  0x2c   : > { %p51_p2 = scmp.eq.s32.totalorder %s963_s23, 0  ;;  %p755_p6 = scmp.lt.s32.totalorder %s963_s23, 2 }
  0x2d   : > { %s1272_s9 = smov (%p1257_p4, %s34_s9), 0  ;;  %p1258_p12 = scmp.ne.s32.totalorder %s1251_s27, 0 }
  0x2e   : > { %s38_s8 = ssub.s32 %s959_s22, %s1272_s9  ;;  %p52_p9 = por %p51_p2, %p50_p1 }
  0x2f   : > { %p41_p8 = scmp.eq.s32.totalorder %s38_s8, 0  ;;  %p1104_p13 = por %p1258_p12, %p50_p1 }
  0x30   : > { %s210_s14 = sand.u32 1, %s951_s20   ;;  %s719_s11 = sshll.u32 %s959_s22, 7 }
  0x31   : > { %s1112_s15 = scalar_select %p41_p8, %s951_s20, %s43_s10  }
  0x32   : > { %s705_s7 = sshll.u32 %s210_s14, 3  ;;  %s1118_s24 = scalar_lea.hbm %s1240_s0, %s719_s11 }
  0x33   : > { %s214_s27 = scalar_lea.vmem [#allocation4], %s705_s7  ;;  %p1122_p11 = pnand %p755_p6, %p52_p9 }
  0x34   : > { %s224_s25 = sshll.u32 %s214_s27, 4  ;;  %s211_s10 = scalar_lea.sflag [#allocation5], %s210_s14  ;;  %s1120_s25 = int_to_ptr.vmem [resolvable:$true] %s224_s25 }
  0x35   : > { %s847_s12 = scalar_lea.hbm %s1118_s24, 128  ;;  %p849_p3 = pneg %p1122_p11 }
  0x36   : > { %p848_p0 = scmp.ne.s32.totalorder %s1118_s24, %s847_s12  ;;  %s852_s11 = scalar_lea.hbm %s1240_s0, 256 }
  0x37   : > { %p853_p10 = scmp.lt.u32.totalorder %s1118_s24, %s1240_s0  ;;  %p854_p4 = scmp.lt.u32.totalorder %s852_s11, %s847_s12 }
  0x38   : > { %p850_p5 = pnand %p849_p3, %p848_p0  ;;  %p856_p2 = scmp.lt.u32.totalorder %s847_s12, %s1118_s24 }
  0x39   : > { %p855_p1 = por %p854_p4, %p853_p10 }
  0x3a   : > { %p851_p7 = pneg %p850_p5 }
  0x3b   : > { %p857_p6 = por %p856_p2, %p855_p1 }
  0x3d   : > { %p858_p8 = pnand %p857_p6, %p851_p7 }
  0x3f   : > { %861 = shalt.err (!%p858_p8)
}
  0x40   : > { %s862_s14 = scalar_lea.vmem %s1120_s25, 128  ;;  %s966_s27 = smov [#allocation4]  }
  0x41   : > { %p863_p9 = scmp.ne.s32.totalorder %s1120_s25, %s862_s14  ;;  %s867_s8 = sshll.u32 %s966_s27, 4  ;;  %s868_s8 = int_to_ptr.vmem [resolvable:$false] %s867_s8 }
  0x42   : > { %s869_s7 = scalar_lea.vmem %s868_s8, 256  ;;  %p870_p5 = scmp.lt.s32.totalorder %s1120_s25, %s868_s8 }
  0x43   : > { %p865_p12 = pnand %p863_p9, %p849_p3  ;;  %p871_p10 = scmp.lt.s32.totalorder %s869_s7, %s862_s14 }
  0x45   : > { %p866_p0 = pneg %p865_p12  ;;  %p872_p4 = por %p871_p10, %p870_p5 }
  0x47   : > { %p873_p1 = pnand %p872_p4, %p866_p0 }
  0x49   : > { %876 = shalt.err (!%p873_p1)
}
  0x4a   : > { %749 = dma.hbm_to_vmem [thread:$0]  (!%p1122_p11), %s1118_s24, 128, %s1120_s25, %s211_s10  }
  0x4b   : > { %p1261_p7 = scmp.ne.s32.totalorder %s1254_s30, 0 }
  0x4c   : > { %s1154_s12 = sand.u32 (!%p1261_p7), 1, %s947_s19   ;;  %p1262_p3 = scmp.ne.s32.totalorder (!%p1261_p7), %s1252_s28, 0 }
  0x4d   : > { %233 = sbr.rel (%p1261_p7) target bundleno = 653 (0x28d), region = 40  ;;  %s709_s11 = sshll.u32 (!%p1261_p7), %s1154_s12, 3 }
  0x4e   : > { %s236_s16 = scalar_lea.sflag (!%p1261_p7), [#allocation5], %s1154_s12  ;;  %s239_s17 = scalar_lea.vmem (!%p1261_p7), [#allocation4], %s709_s11 }
  0x54   : > { %930 = dma.done.wait (%p1262_p3), %s236_s16, 128  }
  0x55   : > { %932 = vsyncadd (%p1262_p3), %s236_s16, 4294967168  ;;  %p1263_p2 = scmp.ne.s32.totalorder %s1250_s26, 0 }
  0x57   : > { %934 = dma.done.wait (%p1263_p2), [#allocation8], 64  }
  0x58   : > { %936 = vsyncadd (%p1263_p2), [#allocation8], 4294967232  ;;  %vm282_vm0 = vcmask 1043456   ;;  %v277_v0 = vld [vmem:[%s239_s17] sm:$0xff]  ;;  %v967_v8 = vmov 0   ;;  %v289_v9 = vlaneseq  ;;  %vm274_vm1 = vcmask 24576  }
  0x59   : > { %v280_v1 = vcombine.high %v277_v0, %v277_v0  ;;  %v283_v2 = vsel %vm282_vm0, %v277_v0, 0.0  ;;  %v357_v4 = vsel %vm282_vm0, %v277_v0, -inf  ;;  %812 = vset.pattern.permute.xlu1 %v967_v8  ;;  %813 = vset.pattern.permute.xlu0 %v967_v8  ;;  %v968_v13 = vmov 1966171168   ;;  %v433_v45 = vld [vmem:[#allocation7] sm:$0xf] }
  0x5a   : > { %v290_v10 = vshrl.u32 %v289_v9, 7  ;;  %v333_v11 = vand.u32 127, %v289_v9  ;;  %v308_v14 = vunpack.c.l.s4 %v968_v13  ;;  %v969_v41 = vmov 0.0   ;;  %v512_v46 = vld [vmem:[%s1243_s3] sm:$0xf]  ;;  %s716_s10 = sshll.u32 %s955_s21, 4 }
  0x5b   : > { %v284_v3 = vsel %vm282_vm0, %v280_v1, 0.0  ;;  %v358_v5 = vsel %vm282_vm0, %v280_v1, -inf  ;;  %275 = vst.msk [vmem:[#allocation2] sm:$0x1] %vm274_vm1, %v969_v41  ;;  %724 = vmatprep.subr.mxu0 %v969_v41  ;;  %729 = vmatprep.subr.mxu1 %v969_v41  ;;  %v970_v44 = vmov -inf   ;;  %vm971_vm2 = vmmov 0   ;;  %s1190_s11 = scalar_lea.hbm %s1245_s5, %s716_s10 }
  0x5c   : > { %v285_v6 = vadd.f32 %v284_v3, %v283_v2  ;;  %v359_v7 = vmax.f32 %v357_v4, %v358_v5  ;;  %v336_v12 = vsub.s32 %v333_v11, %v290_v10  ;;  %v291_v15 = vsub.s32 0, %v290_v10  ;;  %276 = vst.msk [vmem:[#allocation3] sm:$0x1] %vm274_vm1, %v970_v44  ;;  %725 = vmatpush3.msk.msra.mxu0 %vm282_vm0, %v433_v45  ;;  %v434_v62 = vld [vmem:[%s1242_s2] sm:$0x1]  ;;  %s268_s14 = scalar_lea.vmem [#allocation9], %s1154_s12 }
  0x5d   : > { %v295_v16 = vsub.s32 1, %v290_v10  ;;  %v299_v17 = vsub.s32 2, %v290_v10  ;;  %v303_v18 = vsub.s32 3, %v290_v10  ;;  %v309_v19 = vunpack.c.0.s8 %v308_v14  ;;  %726 = vmatprep.mubr.msk.f32.mxu0 %vm971_vm2, %v969_v41  ;;  %731 = vmatprep.mubr.msk.f32.mxu1 %vm971_vm2, %v969_v41  ;;  %v513_v0 = vld [vmem:[%s1244_s4] sm:$0x1]  ;;  %s613_s27 = sshll.u32 %s268_s14, 4  ;;  %s1192_s27 = int_to_ptr.vmem [resolvable:$true] %s613_s27 }
  0x5e   : > { %286 = vadd.xlane.f32.xlu0 %v285_v6  ;;  %730 = vmatpush3.msk.msra.mxu1 %vm282_vm0, %v512_v46  ;;  %vm435_vm3 = vcmask 31744   ;;  %s601_s16 = scalar_lea.sflag [#allocation6], %s1154_s12  ;;  %s877_s17 = scalar_lea.vmem %s1192_s27, 16 }
  0x5f   : > { %v312_v25 = vsub.s32 %v309_v19, %v290_v10  ;;  %p878_p11 = scmp.ne.s32.totalorder %s1192_s27, %s877_s17  ;;  %s972_s21 = smov [#allocation9]  }
  0x60   : > { %s881_s26 = sshll.u32 %s972_s21, 4  ;;  %s882_s26 = int_to_ptr.vmem [resolvable:$false] %s881_s26 }
  0x61   : > { %p879_p6 = pnand %p878_p11, %p1104_p13  ;;  %s883_s28 = scalar_lea.vmem %s882_s26, 32 }
  0x62   : > { %360 = vmax.xlane.f32.xlu0 %v359_v7  ;;  %v278_v51 = vld [vmem:[#allocation2] sm:$0x1]  ;;  %p884_p9 = scmp.lt.s32.totalorder %s1192_s27, %s882_s26  ;;  %p885_p12 = scmp.lt.s32.totalorder %s883_s28, %s877_s17 }
  0x63   : > { %v356_v56 = vld [vmem:[#allocation3] sm:$0x1]  ;;  %p880_p8 = pneg %p879_p6 }
  0x64   : > { %p886_p0 = por %p885_p12, %p884_p9 }
  0x66   : > { %p887_p5 = pnand %p886_p0, %p880_p8 }
  0xeb   : > { %v287_v20 = vpop.xlane.xlu0 %286 }
  0xec   : > { %v292_v21 = vrot.slane %v287_v20, %v291_v15  ;;  %v296_v22 = vrot.slane %v287_v20, %v295_v16  ;;  %v300_v23 = vrot.slane %v287_v20, %v299_v17  ;;  %v304_v24 = vrot.slane %v287_v20, %v303_v18 }
  0xee   : > { %v305_v26 = vcombine.low %v292_v21, %v296_v22  ;;  %v306_v27 = vcombine.low %v300_v23, %v304_v24 }
  0xef   : > { %v361_v28 = vpop.xlane.xlu0 %360 }
  0xf0   : > { %v366_v29 = vrot.slane %v361_v28, %v291_v15  ;;  %v370_v30 = vrot.slane %v361_v28, %v295_v16  ;;  %v374_v31 = vrot.slane %v361_v28, %v299_v17  ;;  %v378_v32 = vrot.slane %v361_v28, %v303_v18 }
  0xf1   : > { %v313_v33 = vrot.slane %v305_v26, %v312_v25  ;;  %v320_v34 = vrot.slane %v306_v27, %v312_v25 }
  0xf2   : > { %v379_v35 = vcombine.low %v366_v29, %v370_v30  ;;  %v380_v36 = vcombine.low %v374_v31, %v378_v32 }
  0xf3   : > { %v321_v37 = vcombine.low %v313_v33, %v320_v34 }
  0xf4   : > { %v387_v38 = vrot.slane %v379_v35, %v312_v25  ;;  %v394_v39 = vrot.slane %v380_v36, %v312_v25 }
  0xf5   : > { %v328_v40 = vrot.slane %v321_v37, %v312_v25 }
  0xf6   : > { %v395_v42 = vcombine.low %v387_v38, %v394_v39 }
  0xf7   : > { %330 = vperm.xlu1 %812, %v328_v40  }
  0xf8   : > { %v402_v43 = vrot.slane %v395_v42, %v312_v25 }
  0xfb   : > { %404 = vperm.xlu1 %812, %v402_v43  }
 0x176   : > { %v331_v47 = vpop.permute.xlu1 %330 }
 0x177   : > { %v337_v48 = vrot.slane %v331_v47, %v336_v12 }
 0x179   : > { %v344_v49 = vrot.slane %v337_v48, %v312_v25 }
 0x17a   : > { %v405_v50 = vpop.permute.xlu1 %404 }
 0x17b   : > { %v351_v52 = vrot.slane %v344_v49, %v312_v25  ;;  %v409_v53 = vrot.slane %v405_v50, %v336_v12 }
 0x17d   : > { %v416_v54 = vrot.slane %v409_v53, %v312_v25  ;;  %v353_v55 = vadd.f32 %v351_v52, %v278_v51 }
 0x17f   : > { %v423_v57 = vrot.slane %v416_v54, %v312_v25  ;;  %355 = vst.msk [vmem:[#allocation2] sm:$0x1] %vm274_vm1, %v353_v55 }
 0x181   : > { %v425_v58 = vmax.f32 %v356_v56, %v423_v57 }
 0x183   : > { %426 = vst.msk [vmem:[#allocation3] sm:$0x1] %vm274_vm1, %v425_v58 }
 0x186   : > { %v430_v59 = vld [vmem:[#allocation2] sm:$0x1] }
 0x187   : > { %v431_v60 = vmul.f32 0.00390625, %v430_v59 }
 0x189   : > { %727 = vmatmul.mubr.msk.f32.vlgmr.msra.gmra.mrb[0].mxu0 %vm435_vm3, %v431_v60 }
 0x18a   : > { %v432_v61 = vld [vmem:[#allocation3] sm:$0x1] }
 0x18b   : > { %732 = vmatmul.mubr.msk.f32.vlgmr.msra.gmra.mrb[0].mxu1 %vm435_vm3, %v432_v61 }
 0x25c   : > { %v508_v63 = vpop.f32.mrb[0].mxu0 }
 0x25d   : > { %v509_v1 = vadd.f32 %v508_v63, %v434_v62  ;;  %v728_v2 = vpop.f32.mrb[1].mxu0 }
 0x25e   : > { %v586_v3 = vpop.f32.mrb[0].mxu1 }
 0x25f   : > { %v587_v4 = vadd.f32 %v586_v3, %v513_v0  ;;  %v733_v5 = vpop.f32.mrb[1].mxu1  ;;  %v590_v6 = vmax.f32 %v509_v1, 0.0 }
 0x261   : > { %v591_v7 = vmax.f32 %v587_v4, 0.0 }
 0x263   : > { %v592_v8 = vadd.f32 %v591_v7, %v590_v6 }
 0x265   : > { %v715_v9 = vmul.f32 -1.442695, %v592_v8 }
 0x267   : > { %815 = vpow2.f32 %v715_v9 }
 0x271   : > { %v816_v10 = vpop.eup %815 }
 0x272   : > { %v596_v11 = vadd.f32 1.0, %v816_v10 }
 0x274   : > { %817 = vrcp.f32 %v596_v11 }
 0x27e   : > { %v818_v12 = vpop.eup %817 }
 0x27f   : > { %599 = vst.msk [vmem:[%s268_s14] sm:$0x1] %vm274_vm1, %v818_v12 }
 0x280   : > { %890 = shalt.err (!%p887_p5)
}
 0x281   : > { %s891_s12 = scalar_lea.hbm %s1190_s11, 16  ;;  %s895_s25 = scalar_lea.hbm %s1245_s5, 32 }
 0x282   : > { %p892_p10 = scmp.ne.s32.totalorder %s1190_s11, %s891_s12  ;;  %p896_p7 = scmp.lt.u32.totalorder %s1190_s11, %s1245_s5 }
 0x283   : > { %p897_p3 = scmp.lt.u32.totalorder %s895_s25, %s891_s12  ;;  %p899_p11 = scmp.lt.u32.totalorder %s891_s12, %s1190_s11 }
 0x284   : > { %p893_p4 = pnand %p892_p10, %p1104_p13 }
 0x285   : > { %p898_p2 = por %p897_p3, %p896_p7 }
 0x286   : > { %p894_p1 = pneg %p893_p4 }
 0x287   : > { %p900_p6 = por %p899_p11, %p898_p2 }
 0x289   : > { %p901_p8 = pnand %p900_p6, %p894_p1 }
 0x28b   : > { %904 = shalt.err (!%p901_p8)
}
 0x28c   : > { %740 = dma.vmem_to_hbm [thread:$0]  (%p1104_p13), %s1192_s27, 16, %s1190_s11, %s601_s16  }
 0x28d PF: > { %s625_s14 = sand.u32 1, %s943_s18   ;;  %p1264_p9 = scmp.ne.s32.totalorder %s1253_s29, 0 }
 0x28e   : > { %p1265_p12 = scmp.ge.s32.totalorder %s963_s23, 2  ;;  %s626_s8 = scalar_lea.sflag [#allocation6], %s625_s14 }
 0x290   : > { %p751_p0 = pnand %p1265_p12, %p1264_p9 }
 0x292   : > { %938 = dma.done.wait (!%p751_p0), %s626_s8, 16  }
 0x293   : > { %940 = vsyncadd (!%p751_p0), %s626_s8, 4294967280  ;;  %s22_s23 = sadd.s32 1, %s963_s23   ;;  %s1266_s18 = smov %s947_s19 }
 0x294   : > { %p19_p5 = scmp.ge.s32.totalorder %s22_s23, 4   ;;  %s1267_s19 = smov %s951_s20 }
 0x295   : > { %s1268_s20 = smov %s1112_s15  ;;  %s1269_s21 = smov %s959_s22 }
 0x296   : > { %s1270_s22 = smov %s1272_s9  ;;  %21 = sbr.rel (!%p19_p5) target bundleno = 7 (0x7), region = 97 }
 0x29d   :  { %630 = vsyncpa [#allocation5], 1 }
 0x29e   :  { %632 = vsyncpa [#allocation5 + $0x1], 1 }
 0x29f   :  { %633 = vsyncpa [#allocation8], 1 }
 0x2a0   :  { %634 = vsyncpa [#allocation6], 1 }
 0x2a1   :  { %636 = vsyncpa [#allocation6 + $0x1], 1 }

</bundles_post_ra>
